<compile_context>
chip_gen: v7x
topology: tpu7x:2x2x1
jax: 0.10.0
libtpu: 0.0.40
codegen_flags: <defaults>
</compile_context>

<pallas_src>
import jax
import jax.numpy as jnp
from jax.experimental import pallas as pl
from jax.experimental.pallas import tpu as pltpu

# ---- module constants (mirroring board/bigdata.py) --------------------------
HIDDEN_DIM = 15
OUTPUT_DIM = 1
SEQ_LENGTH = 2
INPUT_DIM = 8      # small input feature size
NUM_LAYERS = 2     # `layers` ctor arg
BATCH = 4


# ---- Pallas kernel ----------------------------------------------------------
def _lstm_fc_kernel(x_ref,       # (T*B, D)  time-major flattened input
                    wih0_ref,    # (D, 4H)   layer-0 input weights (gate-fused, transposed)
                    whh0_ref,    # (H, 4H)   layer-0 hidden weights
                    b0_ref,      # (1, 4H)   layer-0 combined bias (b_ih + b_hh)
                    wcat1_ref,   # (2H, 4H)  layer-1 fused [input; hidden] weights
                    b1_ref,      # (1, 4H)   layer-1 combined bias
                    wfc_ref,     # (H, O)    fc weight (transposed)
                    bfc_ref,     # (1, O)    fc bias
                    out_ref):    # (B, O)
    TB = x_ref.shape[0]
    H4 = whh0_ref.shape[1]
    H = H4 // 4
    B = out_ref.shape[0]
    T = TB // B

    # ---- hoisted layer-0 input projection for ALL timesteps (1 matmul) ------
    # (T*B, D) @ (D, 4H) + (1, 4H): no recurrent dependency, off the serial chain.
    xp = (jnp.dot(x_ref[...], wih0_ref[...], preferred_element_type=jnp.float32)
          + b0_ref[...])                                   # (T*B, 4H)

    whh0 = whh0_ref[...]
    wcat1 = wcat1_ref[...]
    b1 = b1_ref[...]

    def gates_to_hc(g, c):
        # g: (B, 4H) fused pre-activations, gate order i, f, g, o (PyTorch).
        i = jax.nn.sigmoid(g[:, 0 * H:1 * H])
        f = jax.nn.sigmoid(g[:, 1 * H:2 * H])
        gg = jnp.tanh(g[:, 2 * H:3 * H])
        o = jax.nn.sigmoid(g[:, 3 * H:4 * H])
        c_new = f * c + i * gg
        h_new = o * jnp.tanh(c_new)
        return h_new, c_new

    h0 = jnp.zeros((B, H), jnp.float32)
    c0 = jnp.zeros((B, H), jnp.float32)
    h1 = jnp.zeros((B, H), jnp.float32)
    c1 = jnp.zeros((B, H), jnp.float32)

    # T is a compile-time constant -> fully unrolled time loop.
    for t in range(T):
        # ---- layer 0: one recurrent matmul per step ---------------------------
        g0 = xp[t * B:(t + 1) * B, :] + jnp.dot(
            h0, whh0, preferred_element_type=jnp.float32)          # (B, 4H)
        h0, c0 = gates_to_hc(g0, c0)

        # ---- layer 1: input + recurrent fused into one matmul -----------------
        xh = jnp.concatenate([h0, h1], axis=-1)                    # (B, 2H)
        g1 = jnp.dot(xh, wcat1, preferred_element_type=jnp.float32) + b1
        h1, c1 = gates_to_hc(g1, c1)

    # ---- fc on the last timestep's top-layer hidden state ----------------------
    y = jnp.dot(h1, wfc_ref[...], preferred_element_type=jnp.float32) + bfc_ref[...]
    out_ref[...] = y.astype(out_ref.dtype)


# ---- one-time weight packing (kept OUT of the per-call path) ----------------
def pack_params(params):
    """Repack PyTorch-convention LSTM/Linear weights into the fused kernel layout."""
    return {
        "wih0": params["w_ih_l0"].T,                                   # (D, 4H)
        "whh0": params["w_hh_l0"].T,                                   # (H, 4H)
        "b0":   (params["b_ih_l0"] + params["b_hh_l0"])[None, :],      # (1, 4H)
        "wcat1": jnp.concatenate(                                      # (2H, 4H)
            [params["w_ih_l1"].T, params["w_hh_l1"].T], axis=0),
        "b1":   (params["b_ih_l1"] + params["b_hh_l1"])[None, :],      # (1, 4H)
        "wfc":  params["w_fc"].T,                                      # (H, O)
        "bfc":  params["b_fc"][None, :],                               # (1, O)
    }


# ---- wrapper ----------------------------------------------------------------
def net_forward(x, packed):
    """x: (B, T, INPUT_DIM) float32 -> (B, OUTPUT_DIM) float32."""
    B, T, D = x.shape

    # time-major flatten so timestep t occupies rows [t*B, (t+1)*B) (contiguous
    # static slice inside the kernel); B*T = 8 fills the sublane dimension.
    x_tb = jnp.reshape(jnp.transpose(x, (1, 0, 2)), (T * B, D))

    args = (
        x_tb,
        packed["wih0"], packed["whh0"], packed["b0"],
        packed["wcat1"], packed["b1"],
        packed["wfc"], packed["bfc"],
    )

    # Whole problem is a few KiB -> single invocation, everything resident in
    # VMEM, no grid / pipelining (would only add per-step overhead).
    vmem = pl.BlockSpec(memory_space=pltpu.MemorySpace.VMEM)
    return pl.pallas_call(
        _lstm_fc_kernel,
        out_shape=jax.ShapeDtypeStruct((B, OUTPUT_DIM), jnp.float32),
        in_specs=[vmem] * len(args),
        out_specs=vmem,
    )(*args)


# ---- deterministic parameter init (PyTorch-style uniform) -------------------
def init_params(key):
    H, D, O = HIDDEN_DIM, INPUT_DIM, OUTPUT_DIM
    k_lstm = 1.0 / jnp.sqrt(H)
    k_fc = 1.0 / jnp.sqrt(H)
    keys = jax.random.split(key, 10)

    def u(k, shape, bound):
        return jax.random.uniform(k, shape, jnp.float32, -bound, bound)

    return {
        "w_ih_l0": u(keys[0], (4 * H, D), k_lstm),
        "w_hh_l0": u(keys[1], (4 * H, H), k_lstm),
        "b_ih_l0": u(keys[2], (4 * H,), k_lstm),
        "b_hh_l0": u(keys[3], (4 * H,), k_lstm),
        "w_ih_l1": u(keys[4], (4 * H, H), k_lstm),
        "w_hh_l1": u(keys[5], (4 * H, H), k_lstm),
        "b_ih_l1": u(keys[6], (4 * H,), k_lstm),
        "b_hh_l1": u(keys[7], (4 * H,), k_lstm),
        "w_fc":    u(keys[8], (O, H), k_fc),
        "b_fc":    u(keys[9], (O,), k_fc),
    }


# ---- pure-JAX reference (mirrors torch.nn.LSTM math) ------------------------
def reference_forward(x, params):
    H = HIDDEN_DIM
    B, T, _ = x.shape

    def cell(xt, h, c, w_ih, w_hh, b_ih, b_hh):
        g = xt @ w_ih.T + h @ w_hh.T + b_ih + b_hh
        i = jax.nn.sigmoid(g[:, 0 * H:1 * H])
        f = jax.nn.sigmoid(g[:, 1 * H:2 * H])
        gg = jnp.tanh(g[:, 2 * H:3 * H])
        o = jax.nn.sigmoid(g[:, 3 * H:4 * H])
        c = f * c + i * gg
        h = o * jnp.tanh(c)
        return h, c

    h0 = c0 = h1 = c1 = jnp.zeros((B, H), jnp.float32)
    for t in range(T):
        h0, c0 = cell(x[:, t, :], h0, c0,
                      params["w_ih_l0"], params["w_hh_l0"],
                      params["b_ih_l0"], params["b_hh_l0"])
        h1, c1 = cell(h0, h1, c1,
                      params["w_ih_l1"], params["w_hh_l1"],
                      params["b_ih_l1"], params["b_hh_l1"])
    return h1 @ params["w_fc"].T + params["b_fc"]


if __name__ == "__main__":
    key = jax.random.PRNGKey(0)
    pkey, xkey = jax.random.split(key)

    params = init_params(pkey)
    packed = pack_params(params)          # one-time packing, not per forward call
    packed = jax.tree_util.tree_map(jax.block_until_ready, packed)

    x = jax.random.normal(xkey, (BATCH, SEQ_LENGTH, INPUT_DIM), jnp.float32)

    fwd = jax.jit(net_forward)
    y = fwd(x, packed)
    jax.block_until_ready(y)

    y_ref = reference_forward(x, params)
    assert y.shape == (BATCH, OUTPUT_DIM)
    assert jnp.allclose(y, y_ref, atol=1e-4, rtol=1e-4), (y, y_ref)

    print("KERNEL_OK")
</pallas_src>

<mosaic_0001>
module attributes {stable_mosaic.version = 11 : i64} {
  func.func @_lstm_fc_kernel(%arg0: memref<8x8xf32, #tpu.memory_space<vmem>>, %arg1: memref<8x60xf32, #tpu.memory_space<vmem>>, %arg2: memref<15x60xf32, #tpu.memory_space<vmem>>, %arg3: memref<1x60xf32, #tpu.memory_space<vmem>>, %arg4: memref<30x60xf32, #tpu.memory_space<vmem>>, %arg5: memref<1x60xf32, #tpu.memory_space<vmem>>, %arg6: memref<15x1xf32, #tpu.memory_space<vmem>>, %arg7: memref<1x1xf32, #tpu.memory_space<vmem>>, %arg8: memref<4x1xf32, #tpu.memory_space<vmem>>) attributes {dimension_semantics = [], scalar_prefetch = 0 : i64, scratch_operands = 0 : i64, tpu.core_type = #tpu.core_type<tc>} {
    %c0 = arith.constant 0 : index
    %c0_0 = arith.constant 0 : index
    %0 = vector.load %arg0[%c0, %c0_0] : memref<8x8xf32, #tpu.memory_space<vmem>>, vector<8x8xf32>
    %c0_1 = arith.constant 0 : index
    %c0_2 = arith.constant 0 : index
    %1 = vector.load %arg1[%c0_1, %c0_2] : memref<8x60xf32, #tpu.memory_space<vmem>>, vector<8x60xf32>
    %cst = arith.constant dense<0.000000e+00> : vector<8x60xf32>
    %2 = tpu.matmul %0, %1, %cst {dimension_numbers = #tpu.dot_dimension_numbers<[1], [0], [0], [1], [0, 0, 1, 1], [], []>} : vector<8x8xf32>, vector<8x60xf32>, vector<8x60xf32> -> vector<8x60xf32>
    %c0_3 = arith.constant 0 : index
    %c0_4 = arith.constant 0 : index
    %3 = vector.load %arg3[%c0_3, %c0_4] : memref<1x60xf32, #tpu.memory_space<vmem>>, vector<1x60xf32>
    %4 = vector.broadcast %3 : vector<1x60xf32> to vector<8x60xf32>
    %5 = arith.addf %2, %4 : vector<8x60xf32>
    %c0_5 = arith.constant 0 : index
    %c0_6 = arith.constant 0 : index
    %6 = vector.load %arg2[%c0_5, %c0_6] : memref<15x60xf32, #tpu.memory_space<vmem>>, vector<15x60xf32>
    %c0_7 = arith.constant 0 : index
    %c0_8 = arith.constant 0 : index
    %7 = vector.load %arg4[%c0_7, %c0_8] : memref<30x60xf32, #tpu.memory_space<vmem>>, vector<30x60xf32>
    %c0_9 = arith.constant 0 : index
    %c0_10 = arith.constant 0 : index
    %8 = vector.load %arg5[%c0_9, %c0_10] : memref<1x60xf32, #tpu.memory_space<vmem>>, vector<1x60xf32>
    %cst_11 = arith.constant 0.000000e+00 : f32
    %9 = vector.broadcast %cst_11 : f32 to vector<4x15xf32>
    %cst_12 = arith.constant 0.000000e+00 : f32
    %10 = vector.broadcast %cst_12 : f32 to vector<4x15xf32>
    %cst_13 = arith.constant 0.000000e+00 : f32
    %11 = vector.broadcast %cst_13 : f32 to vector<4x15xf32>
    %cst_14 = arith.constant 0.000000e+00 : f32
    %12 = vector.broadcast %cst_14 : f32 to vector<4x15xf32>
    %13 = vector.extract_strided_slice %5 {offsets = [0, 0], sizes = [4, 60], strides = [1, 1]} : vector<8x60xf32> to vector<4x60xf32>
    %cst_15 = arith.constant dense<0.000000e+00> : vector<4x60xf32>
    %14 = tpu.matmul %9, %6, %cst_15 {dimension_numbers = #tpu.dot_dimension_numbers<[1], [0], [0], [1], [0, 0, 1, 1], [], []>} : vector<4x15xf32>, vector<15x60xf32>, vector<4x60xf32> -> vector<4x60xf32>
    %15 = arith.addf %13, %14 : vector<4x60xf32>
    %16 = vector.extract_strided_slice %15 {offsets = [0, 0], sizes = [4, 15], strides = [1, 1]} : vector<4x60xf32> to vector<4x15xf32>
    %17 = arith.negf %16 : vector<4x15xf32>
    %18 = math.exp %17 : vector<4x15xf32>
    %cst_16 = arith.constant 1.000000e+00 : f32
    %19 = vector.broadcast %cst_16 : f32 to vector<4x15xf32>
    %20 = arith.addf %19, %18 : vector<4x15xf32>
    %21 = arith.divf %19, %20 : vector<4x15xf32>
    %22 = vector.extract_strided_slice %15 {offsets = [0, 15], sizes = [4, 15], strides = [1, 1]} : vector<4x60xf32> to vector<4x15xf32>
    %23 = arith.negf %22 : vector<4x15xf32>
    %24 = math.exp %23 : vector<4x15xf32>
    %cst_17 = arith.constant 1.000000e+00 : f32
    %25 = vector.broadcast %cst_17 : f32 to vector<4x15xf32>
    %26 = arith.addf %25, %24 : vector<4x15xf32>
    %27 = arith.divf %25, %26 : vector<4x15xf32>
    %28 = vector.extract_strided_slice %15 {offsets = [0, 30], sizes = [4, 15], strides = [1, 1]} : vector<4x60xf32> to vector<4x15xf32>
    %29 = math.tanh %28 : vector<4x15xf32>
    %30 = vector.extract_strided_slice %15 {offsets = [0, 45], sizes = [4, 15], strides = [1, 1]} : vector<4x60xf32> to vector<4x15xf32>
    %31 = arith.negf %30 : vector<4x15xf32>
    %32 = math.exp %31 : vector<4x15xf32>
    %cst_18 = arith.constant 1.000000e+00 : f32
    %33 = vector.broadcast %cst_18 : f32 to vector<4x15xf32>
    %34 = arith.addf %33, %32 : vector<4x15xf32>
    %35 = arith.divf %33, %34 : vector<4x15xf32>
    %36 = arith.mulf %27, %10 : vector<4x15xf32>
    %37 = arith.mulf %21, %29 : vector<4x15xf32>
    %38 = arith.addf %36, %37 : vector<4x15xf32>
    %39 = math.tanh %38 : vector<4x15xf32>
    %40 = arith.mulf %35, %39 : vector<4x15xf32>
    %41 = tpu.concatenate %40, %11 in 1 : vector<4x15xf32>, vector<4x15xf32> -> vector<4x30xf32>
    %cst_19 = arith.constant dense<0.000000e+00> : vector<4x60xf32>
    %42 = tpu.matmul %41, %7, %cst_19 {dimension_numbers = #tpu.dot_dimension_numbers<[1], [0], [0], [1], [0, 0, 1, 1], [], []>} : vector<4x30xf32>, vector<30x60xf32>, vector<4x60xf32> -> vector<4x60xf32>
    %43 = vector.broadcast %8 : vector<1x60xf32> to vector<4x60xf32>
    %44 = arith.addf %42, %43 : vector<4x60xf32>
    %45 = vector.extract_strided_slice %44 {offsets = [0, 0], sizes = [4, 15], strides = [1, 1]} : vector<4x60xf32> to vector<4x15xf32>
    %46 = arith.negf %45 : vector<4x15xf32>
    %47 = math.exp %46 : vector<4x15xf32>
    %cst_20 = arith.constant 1.000000e+00 : f32
    %48 = vector.broadcast %cst_20 : f32 to vector<4x15xf32>
    %49 = arith.addf %48, %47 : vector<4x15xf32>
    %50 = arith.divf %48, %49 : vector<4x15xf32>
    %51 = vector.extract_strided_slice %44 {offsets = [0, 15], sizes = [4, 15], strides = [1, 1]} : vector<4x60xf32> to vector<4x15xf32>
    %52 = arith.negf %51 : vector<4x15xf32>
    %53 = math.exp %52 : vector<4x15xf32>
    %cst_21 = arith.constant 1.000000e+00 : f32
    %54 = vector.broadcast %cst_21 : f32 to vector<4x15xf32>
    %55 = arith.addf %54, %53 : vector<4x15xf32>
    %56 = arith.divf %54, %55 : vector<4x15xf32>
    %57 = vector.extract_strided_slice %44 {offsets = [0, 30], sizes = [4, 15], strides = [1, 1]} : vector<4x60xf32> to vector<4x15xf32>
    %58 = math.tanh %57 : vector<4x15xf32>
    %59 = vector.extract_strided_slice %44 {offsets = [0, 45], sizes = [4, 15], strides = [1, 1]} : vector<4x60xf32> to vector<4x15xf32>
    %60 = arith.negf %59 : vector<4x15xf32>
    %61 = math.exp %60 : vector<4x15xf32>
    %cst_22 = arith.constant 1.000000e+00 : f32
    %62 = vector.broadcast %cst_22 : f32 to vector<4x15xf32>
    %63 = arith.addf %62, %61 : vector<4x15xf32>
    %64 = arith.divf %62, %63 : vector<4x15xf32>
    %65 = arith.mulf %56, %12 : vector<4x15xf32>
    %66 = arith.mulf %50, %58 : vector<4x15xf32>
    %67 = arith.addf %65, %66 : vector<4x15xf32>
    %68 = math.tanh %67 : vector<4x15xf32>
    %69 = arith.mulf %64, %68 : vector<4x15xf32>
    %70 = vector.extract_strided_slice %5 {offsets = [4, 0], sizes = [4, 60], strides = [1, 1]} : vector<8x60xf32> to vector<4x60xf32>
    %cst_23 = arith.constant dense<0.000000e+00> : vector<4x60xf32>
    %71 = tpu.matmul %40, %6, %cst_23 {dimension_numbers = #tpu.dot_dimension_numbers<[1], [0], [0], [1], [0, 0, 1, 1], [], []>} : vector<4x15xf32>, vector<15x60xf32>, vector<4x60xf32> -> vector<4x60xf32>
    %72 = arith.addf %70, %71 : vector<4x60xf32>
    %73 = vector.extract_strided_slice %72 {offsets = [0, 0], sizes = [4, 15], strides = [1, 1]} : vector<4x60xf32> to vector<4x15xf32>
    %74 = arith.negf %73 : vector<4x15xf32>
    %75 = math.exp %74 : vector<4x15xf32>
    %cst_24 = arith.constant 1.000000e+00 : f32
    %76 = vector.broadcast %cst_24 : f32 to vector<4x15xf32>
    %77 = arith.addf %76, %75 : vector<4x15xf32>
    %78 = arith.divf %76, %77 : vector<4x15xf32>
    %79 = vector.extract_strided_slice %72 {offsets = [0, 15], sizes = [4, 15], strides = [1, 1]} : vector<4x60xf32> to vector<4x15xf32>
    %80 = arith.negf %79 : vector<4x15xf32>
    %81 = math.exp %80 : vector<4x15xf32>
    %cst_25 = arith.constant 1.000000e+00 : f32
    %82 = vector.broadcast %cst_25 : f32 to vector<4x15xf32>
    %83 = arith.addf %82, %81 : vector<4x15xf32>
    %84 = arith.divf %82, %83 : vector<4x15xf32>
    %85 = vector.extract_strided_slice %72 {offsets = [0, 30], sizes = [4, 15], strides = [1, 1]} : vector<4x60xf32> to vector<4x15xf32>
    %86 = math.tanh %85 : vector<4x15xf32>
    %87 = vector.extract_strided_slice %72 {offsets = [0, 45], sizes = [4, 15], strides = [1, 1]} : vector<4x60xf32> to vector<4x15xf32>
    %88 = arith.negf %87 : vector<4x15xf32>
    %89 = math.exp %88 : vector<4x15xf32>
    %cst_26 = arith.constant 1.000000e+00 : f32
    %90 = vector.broadcast %cst_26 : f32 to vector<4x15xf32>
    %91 = arith.addf %90, %89 : vector<4x15xf32>
    %92 = arith.divf %90, %91 : vector<4x15xf32>
    %93 = arith.mulf %84, %38 : vector<4x15xf32>
    %94 = arith.mulf %78, %86 : vector<4x15xf32>
    %95 = arith.addf %93, %94 : vector<4x15xf32>
    %96 = math.tanh %95 : vector<4x15xf32>
    %97 = arith.mulf %92, %96 : vector<4x15xf32>
    %98 = tpu.concatenate %97, %69 in 1 : vector<4x15xf32>, vector<4x15xf32> -> vector<4x30xf32>
    %cst_27 = arith.constant dense<0.000000e+00> : vector<4x60xf32>
    %99 = tpu.matmul %98, %7, %cst_27 {dimension_numbers = #tpu.dot_dimension_numbers<[1], [0], [0], [1], [0, 0, 1, 1], [], []>} : vector<4x30xf32>, vector<30x60xf32>, vector<4x60xf32> -> vector<4x60xf32>
    %100 = vector.broadcast %8 : vector<1x60xf32> to vector<4x60xf32>
    %101 = arith.addf %99, %100 : vector<4x60xf32>
    %102 = vector.extract_strided_slice %101 {offsets = [0, 0], sizes = [4, 15], strides = [1, 1]} : vector<4x60xf32> to vector<4x15xf32>
    %103 = arith.negf %102 : vector<4x15xf32>
    %104 = math.exp %103 : vector<4x15xf32>
    %cst_28 = arith.constant 1.000000e+00 : f32
    %105 = vector.broadcast %cst_28 : f32 to vector<4x15xf32>
    %106 = arith.addf %105, %104 : vector<4x15xf32>
    %107 = arith.divf %105, %106 : vector<4x15xf32>
    %108 = vector.extract_strided_slice %101 {offsets = [0, 15], sizes = [4, 15], strides = [1, 1]} : vector<4x60xf32> to vector<4x15xf32>
    %109 = arith.negf %108 : vector<4x15xf32>
    %110 = math.exp %109 : vector<4x15xf32>
    %cst_29 = arith.constant 1.000000e+00 : f32
    %111 = vector.broadcast %cst_29 : f32 to vector<4x15xf32>
    %112 = arith.addf %111, %110 : vector<4x15xf32>
    %113 = arith.divf %111, %112 : vector<4x15xf32>
    %114 = vector.extract_strided_slice %101 {offsets = [0, 30], sizes = [4, 15], strides = [1, 1]} : vector<4x60xf32> to vector<4x15xf32>
    %115 = math.tanh %114 : vector<4x15xf32>
    %116 = vector.extract_strided_slice %101 {offsets = [0, 45], sizes = [4, 15], strides = [1, 1]} : vector<4x60xf32> to vector<4x15xf32>
    %117 = arith.negf %116 : vector<4x15xf32>
    %118 = math.exp %117 : vector<4x15xf32>
    %cst_30 = arith.constant 1.000000e+00 : f32
    %119 = vector.broadcast %cst_30 : f32 to vector<4x15xf32>
    %120 = arith.addf %119, %118 : vector<4x15xf32>
    %121 = arith.divf %119, %120 : vector<4x15xf32>
    %122 = arith.mulf %113, %67 : vector<4x15xf32>
    %123 = arith.mulf %107, %115 : vector<4x15xf32>
    %124 = arith.addf %122, %123 : vector<4x15xf32>
    %125 = math.tanh %124 : vector<4x15xf32>
    %126 = arith.mulf %121, %125 : vector<4x15xf32>
    %c0_31 = arith.constant 0 : index
    %c0_32 = arith.constant 0 : index
    %127 = vector.load %arg6[%c0_31, %c0_32] : memref<15x1xf32, #tpu.memory_space<vmem>>, vector<15x1xf32>
    %cst_33 = arith.constant dense<0.000000e+00> : vector<4x1xf32>
    %128 = tpu.matmul %126, %127, %cst_33 {dimension_numbers = #tpu.dot_dimension_numbers<[1], [0], [0], [1], [0, 0, 1, 1], [], []>} : vector<4x15xf32>, vector<15x1xf32>, vector<4x1xf32> -> vector<4x1xf32>
    %c0_34 = arith.constant 0 : index
    %c0_35 = arith.constant 0 : index
    %129 = vector.load %arg7[%c0_34, %c0_35] : memref<1x1xf32, #tpu.memory_space<vmem>>, vector<1x1xf32>
    %130 = vector.broadcast %129 : vector<1x1xf32> to vector<4x1xf32>
    %131 = arith.addf %128, %130 : vector<4x1xf32>
    %c0_36 = arith.constant 0 : index
    %c0_37 = arith.constant 0 : index
    %132 = vector.load %arg8[%c0_36, %c0_37] : memref<4x1xf32, #tpu.memory_space<vmem>>, vector<4x1xf32>
    tpu.vector_store %arg8[%c0_36, %c0_37], %131 {strides = array<i32>} : memref<4x1xf32, #tpu.memory_space<vmem>>, vector<4x1xf32>,
    return
  }
}

</mosaic_0001>

<bundles_post_ra>
// kernel: net_forward.1
= control target key start
LH: loop header
LB: loop body
LE: loop exit
PB: predicated region body
PF: predicated region fallthrough
CT: control target
= control target key end

     0   :  { %vm40_vm0 = vcmask 64512   ;;  %v793_v0 = vmov 0.0   ;;  %vm794_vm1 = vmmov 0   ;;  %vm125_vm2 = vcmask 1046528   ;;  %s799_s21 = smov 30   ;;  %s956_s1 = inlined_call_operand.vmem [shape: f32[8,60], index: 1, kind: input, shape index: {}]   ;;  %s957_s0 = inlined_call_operand.vmem [shape: f32[8,8], index: 0, kind: input, shape index: {}]   ;;  %s958_s2 = inlined_call_operand.vmem [shape: f32[15,60], index: 2, kind: input, shape index: {}]   ;;  %s959_s3 = inlined_call_operand.vmem [shape: f32[1,60], index: 3, kind: input, shape index: {}]   ;;  %s960_s4 = inlined_call_operand.vmem [shape: f32[30,60], index: 4, kind: input, shape index: {}]   ;;  %s961_s5 = inlined_call_operand.vmem [shape: f32[1,60], index: 5, kind: input, shape index: {}]   ;;  %s962_s6 = inlined_call_operand.vmem [shape: f32[15,1], index: 6, kind: input, shape index: {}]   ;;  %s963_s7 = inlined_call_operand.<no memory space> [shape: f32[1,1], index: 7, kind: input, shape index: {}]   ;;  %s964_s8 = inlined_call_operand.vmem [shape: f32[4,1], index: 8, kind: output, shape index: {}]  }
   0x1   :  { %679 = vmatprep.subr.mxu0 %v793_v0  ;;  %v32_v1 = vld [vmem:[%s956_s1] sm:$0xff]  ;;  %681 = vmatprep.mubr.msk.f32.mxu0 %vm794_vm1, %v793_v0  ;;  %v795_v4 = vmov 0.0|0.0   ;;  %v115_v5 = vld [vmem:[%s958_s2 + $0x8] sm:$0x7f]  ;;  %vm796_vm3 = vmmov 1   ;;  %v118_v27 = vld [vmem:[%s960_s4 + $0x10] sm:$0xff]  ;;  %v13_v31 = vstv %s963_s7 }
   0x2   :  { %v31_v2 = vld [vmem:[%s957_s0] sm:$0xff]  ;;  %680 = vmatpush3.msra.mxu0 %v32_v1  ;;  %727 = vmatprep.subr.bf16.mxu1 %v795_v4  ;;  %vm863_vm4 = vmpackc.low %vm125_vm2, %vm796_vm3  ;;  %v117_v26 = vld [vmem:[%s960_s4 + $0x8] sm:$0xff]  ;;  %vm239_vm5 = vcmask 1045504   ;;  %vm121_vm7 = vcmask 121856   ;;  %vm235_vm8 = vcmask 244736   ;;  %vm635_vm9 = vcmask 3072  }
   0x3   :  { %v114_v3 = vld [vmem:[%s958_s2] sm:$0xff]  ;;  %682 = vmatmul.mubr.msk.f32.vlgmr.msra.gmra.mrb[0].mxu0 %vm40_vm0, %v31_v2  ;;  %688 = vmatprep.mubr.msk.f32.mxu1 %vm794_vm1, %v793_v0  ;;  %s797_s2 = smov 98   ;;  %v119_v29 = vld [vmem:[%s960_s4 + $0x18] sm:$0x3f]  ;;  %vm903_vm6 = vmpackc.low %vm239_vm5, %vm796_vm3  ;;  %14 = vst [vmem:[#allocation2] sm:$0x1] %v13_v31 }
   0x4   :  { %v728_v7 = vpack.c.bf16 %v115_v5, %v114_v3  ;;  %731 = vmatprep.subr.bf16.mxu0 %v795_v4  ;;  %699 = vmatprep.mubr.msk.f32.mxu0 %vm794_vm1, %v793_v0  ;;  %v641_v8 = vld [vmem:[%s959_s3] ss:$0 sm:$0xff]  ;;  %s798_s3 = smov 15   ;;  %v735_v30 = vpack.c.bf16 %v119_v29, %v118_v27 }
   0x5   :  { %v116_v25 = vld [vmem:[%s960_s4] sm:$0xff]  ;;  %s800_s4 = smov 83  }
   0x6   :  { %730 = vmatpush3.bf16.msk.msra.mxu1 %vm863_vm4, %v728_v7  ;;  %v732_v28 = vpack.c.bf16 %v117_v26, %v116_v25  ;;  %v645_v37 = vld [vmem:[%s961_s5] ss:$0 sm:$0xff] }
   0x7   :  { %738 = vmatprep.subr.bf16.mxu1 %v795_v4  ;;  %v548_v27 = vld [vmem:[%s962_s6] sm:$0xff] }
   0x8   :  { %733 = vmatpush3.bf16.msra.mxu0 %v732_v28 }
   0x9   :  { %689 = vmatmul.mubr.f32.vlgmr.msra.gmra.mrb[0].mxu1 %v793_v0  ;;  %734 = vmatprep.subr.bf16.mxu0 %v795_v4 }
   0xa   :  { %741 = vmatpush3.bf16.msk.msra.mxu1 %vm863_vm4, %v728_v7  ;;  %706 = vmatprep.mubr.msk.f32.mxu1 %vm794_vm1, %v793_v0 }
   0xb   :  { %742 = vmatprep.subr.bf16.mxu1 %v795_v4 }
   0xc   :  { %737 = vmatpush3.bf16.msk.msra.mxu0 %vm903_vm6, %v735_v30 }
   0xd   :  { %749 = vmatprep.subr.bf16.mxu0 %v795_v4 }
  0xd6   :  { %v110_v9 = vpop.f32.mrb[0].mxu0 }
  0xd7   :  { %v683_v10 = vpop.f32.mrb[1].mxu0  ;;  %v111_v11 = vadd.f32 %v641_v8, %v110_v9 }
  0xdc   :  { %v195_v12 = vpop.f32.mrb[0].mxu1 }
  0xdd   :  { %v199_v13 = vadd.f32 %v195_v12, %v111_v11  ;;  %v690_v14 = vpop.f32.mrb[1].mxu1 }
  0xdf   :  { %761 = vtanh.f32 %v199_v13  ;;  %v644_v16 = vmul.f32 -1.442695, %v199_v13 }
  0xe1   :  { %763 = vpow2.f32 %v644_v16 }
  0xe9   :  { %v762_v15 = vpop.eup %761 }
  0xea   :  { %209 = vrot.lane.b32.xlu0 %v762_v15, %s797_s2 }
  0xeb   :  { %v764_v17 = vpop.eup %763 }
  0xec   :  { %v203_v18 = vadd.f32 1.0, %v764_v17 }
  0xee   :  { %765 = vrcp.f32 %v203_v18 }
  0xf8   :  { %v766_v19 = vpop.eup %765 }
  0xf9   :  { %v207_v22 = vmul.f32 0.0, %v766_v19 }
 0x15c   :  { %v210_v20 = vpop.permute.xlu0 %209 }
 0x15d   :  { %v212_v21 = vmul.f32 %v766_v19, %v210_v20 }
 0x15f   :  { %214 = vrot.lane.b32.xlu0 %v212_v21, %s798_s3 }
 0x1d1   :  { %v215_v23 = vpop.permute.xlu0 %214 }
 0x1d2   :  { %v887_v24 = vadd.f32 %v215_v23, %v207_v22 }
 0x1d4   :  { %767 = vtanh.f32 %v887_v24  ;;  %v421_v59 = vrot.slane %v887_v24, 4 }
 0x1de   :  { %v768_v32 = vpop.eup %767 }
 0x1df   :  { %220 = vrot.lane.b32.xlu1 %v768_v32, %s799_s21 }
 0x251   :  { %v221_v33 = vpop.permute.xlu1 %220 }
 0x252   :  { %v223_v34 = vmul.f32 %v766_v19, %v221_v33 }
 0x254   :  { %225 = vrot.lane.b32.xlu1 %v223_v34, %s800_s4 }
 0x2c6   :  { %v226_v35 = vpop.permute.xlu1 %225 }
 0x2c7   :  { %v228_v36 = vsel %vm121_vm7, %v226_v35, 0.0  ;;  %707 = vmatmul.mubr.msk.f32.vlgmr.msra.gmra.mrb[2].mxu1 %vm121_vm7, %v226_v35  ;;  %v655_v35 = vld [vmem:[#allocation2] ss:$0 sm:$0xff] }
 0x2c8   :  { %700 = vmatmul.mubr.msk.f32.vlgmr.msra.gmra.mrb[2].mxu0 %vm235_vm8, %v228_v36  ;;  %744 = vmatpush3.bf16.msra.mxu1 %v732_v28  ;;  %v549_v28 = vld [vmem:[%s962_s6 + $0x8] sm:$0x7f] }
 0x2c9   :  { %745 = vmatprep.subr.bf16.mxu1 %v795_v4  ;;  %717 = vmatprep.mubr.msk.f32.mxu1 %vm794_vm1, %v793_v0  ;;  %v750_v29 = vpack.c.bf16 %v549_v28, %v548_v27 }
 0x2ca   :  { %724 = vmatprep.mubr.msk.f32.mxu0 %vm794_vm1, %v793_v0 }
 0x2cb   :  { %752 = vmatpush3.bf16.msk.msra.mxu0 %vm863_vm4, %v750_v29 }
 0x2cc   :  { %748 = vmatpush3.bf16.msk.msra.mxu1 %vm903_vm6, %v735_v30 }
 0x39a   :  { %v405_v38 = vpop.f32.mrb[2].mxu1 }
 0x39b   :  { %v410_v39 = vrot.slane %v405_v38, 4  ;;  %v309_v40 = vpop.f32.mrb[2].mxu0  ;;  %v708_v41 = vpop.f32.mrb[3].mxu1 }
 0x39c   :  { %v310_v42 = vadd.f32 %v645_v37, %v309_v40  ;;  %v701_v43 = vpop.f32.mrb[3].mxu0 }
 0x39d   :  { %v412_v44 = vadd.f32 %v410_v39, %v111_v11 }
 0x39e   :  { %769 = vtanh.f32 %v310_v42  ;;  %v648_v47 = vmul.f32 -1.442695, %v310_v42 }
 0x39f   :  { %771 = vtanh.f32 %v412_v44  ;;  %v651_v48 = vmul.f32 -1.442695, %v412_v44 }
 0x3a0   :  { %773 = vpow2.f32 %v648_v47 }
 0x3a1   :  { %775 = vpow2.f32 %v651_v48 }
 0x3a8   :  { %v770_v45 = vpop.eup %769 }
 0x3a9   :  { %v772_v46 = vpop.eup %771  ;;  %322 = vrot.lane.b32.xlu0 %v770_v45, %s797_s2 }
 0x3aa   :  { %425 = vrot.lane.b32.xlu1 %v772_v46, %s797_s2  ;;  %v774_v49 = vpop.eup %773 }
 0x3ab   :  { %v776_v50 = vpop.eup %775  ;;  %v316_v51 = vadd.f32 1.0, %v774_v49 }
 0x3ac   :  { %v416_v52 = vadd.f32 1.0, %v776_v50 }
 0x3ad   :  { %777 = vrcp.f32 %v316_v51 }
 0x3ae   :  { %779 = vrcp.f32 %v416_v52 }
 0x3b7   :  { %v778_v53 = vpop.eup %777 }
 0x3b8   :  { %v780_v55 = vpop.eup %779  ;;  %v320_v60 = vmul.f32 0.0, %v778_v53 }
 0x3b9   :  { %v423_v62 = vmul.f32 %v780_v55, %v421_v59 }
 0x41b   :  { %v323_v54 = vpop.permute.xlu0 %322 }
 0x41c   :  { %v325_v56 = vmul.f32 %v778_v53, %v323_v54  ;;  %v426_v57 = vpop.permute.xlu1 %425 }
 0x41d   :  { %v428_v58 = vmul.f32 %v780_v55, %v426_v57 }
 0x41e   :  { %327 = vrot.lane.b32.xlu0 %v325_v56, %s798_s3 }
 0x41f   :  { %430 = vrot.lane.b32.xlu1 %v428_v58, %s798_s3 }
 0x490   :  { %v328_v61 = vpop.permute.xlu0 %327 }
 0x491   :  { %v330_v63 = vadd.f32 %v328_v61, %v320_v60  ;;  %v431_v0 = vpop.permute.xlu1 %430 }
 0x492   :  { %v433_v1 = vadd.f32 %v431_v0, %v423_v62 }
 0x493   :  { %781 = vtanh.f32 %v330_v63 }
 0x494   :  { %783 = vtanh.f32 %v433_v1 }
 0x49d   :  { %v782_v2 = vpop.eup %781 }
 0x49e   :  { %v784_v3 = vpop.eup %783  ;;  %333 = vrot.lane.b32.xlu0 %v782_v2, %s799_s21 }
 0x49f   :  { %436 = vrot.lane.b32.xlu1 %v784_v3, %s799_s21 }
 0x510   :  { %v334_v4 = vpop.permute.xlu0 %333 }
 0x511   :  { %v336_v5 = vmul.f32 %v778_v53, %v334_v4  ;;  %v437_v7 = vpop.permute.xlu1 %436 }
 0x512   :  { %v439_v8 = vmul.f32 %v780_v55, %v437_v7 }
 0x513   :  { %v445_v9 = vrot.slane %v336_v5, 4 }
 0x514   :  { %441 = vrot.lane.b32.xlu0 %v439_v8, %s800_s4 }
 0x515   :  { %446 = vrot.lane.b32.xlu1 %v445_v9, %s797_s2 }
 0x586   :  { %v442_v10 = vpop.permute.xlu0 %441 }
 0x587   :  { %v447_v11 = vpop.permute.xlu1 %446 }
 0x588   :  { %v449_v12 = vsel %vm121_vm7, %v442_v10, %v447_v11 }
 0x589   :  { %v451_v13 = vrot.slane %v449_v12, 4 }
 0x58b   :  { %718 = vmatmul.mubr.msk.f32.vlgmr.msra.gmra.mrb[4].mxu1 %vm235_vm8, %v451_v13 }
 0x65e   :  { %v520_v14 = vpop.f32.mrb[4].mxu1 }
 0x65f   :  { %v521_v15 = vadd.f32 %v645_v37, %v520_v14  ;;  %v719_v16 = vpop.f32.mrb[5].mxu1 }
 0x661   :  { %785 = vtanh.f32 %v521_v15  ;;  %v654_v18 = vmul.f32 -1.442695, %v521_v15 }
 0x663   :  { %787 = vpow2.f32 %v654_v18 }
 0x66b   :  { %v786_v17 = vpop.eup %785 }
 0x66c   :  { %533 = vrot.lane.b32.xlu0 %v786_v17, %s797_s2 }
 0x66d   :  { %v788_v19 = vpop.eup %787 }
 0x66e   :  { %v527_v20 = vadd.f32 1.0, %v788_v19 }
 0x670   :  { %789 = vrcp.f32 %v527_v20 }
 0x67a   :  { %v790_v21 = vpop.eup %789 }
 0x67b   :  { %v531_v24 = vmul.f32 %v790_v21, %v330_v63 }
 0x6de   :  { %v534_v22 = vpop.permute.xlu0 %533 }
 0x6df   :  { %v536_v23 = vmul.f32 %v790_v21, %v534_v22 }
 0x6e1   :  { %538 = vrot.lane.b32.xlu1 %v536_v23, %s798_s3 }
 0x753   :  { %v539_v25 = vpop.permute.xlu1 %538 }
 0x754   :  { %v541_v26 = vadd.f32 %v539_v25, %v531_v24 }
 0x756   :  { %791 = vtanh.f32 %v541_v26 }
 0x760   :  { %v792_v30 = vpop.eup %791 }
 0x761   :  { %544 = vrot.lane.b32.xlu0 %v792_v30, %s799_s21 }
 0x7d3   :  { %v545_v32 = vpop.permute.xlu0 %544 }
 0x7d4   :  { %v547_v33 = vmul.f32 %v790_v21, %v545_v32 }
 0x7d6   :  { %558 = vrot.lane.b32.xlu1 %v547_v33, %s800_s4 }
 0x848   :  { %v559_v34 = vpop.permute.xlu1 %558 }
 0x849   :  { %725 = vmatmul.mubr.msk.f32.vlgmr.msra.gmra.mrb[4].mxu0 %vm121_vm7, %v559_v34 }
 0x91c   :  { %v631_v36 = vpop.f32.mrb[4].mxu0 }
 0x91d   :  { %v632_v6 = vadd.f32 %v655_v35, %v631_v36  ;;  %v726_v37 = vpop.f32.mrb[5].mxu0 }
 0x91f   :  { %636 = vst.msk [vmem:[%s964_s8] sm:$0xf] %vm635_vm9, %v632_v6 }

</bundles_post_ra>
